<compile_context>
chip_gen: v7x
topology: tpu7x:2x2x1
jax: 0.10.0
libtpu: 0.0.40
codegen_flags: <defaults>
</compile_context>

<pallas_src>
import jax
import jax.numpy as jnp
from jax.experimental import pallas as pl
from jax.experimental.pallas import tpu as pltpu

EMBEDDING_DIM = 32
LAYERS = [64, 32, 16]


def _round_up(x, m):
    return (x + m - 1) // m * m


def ncf_kernel(ug_ref, ig_ref, um_ref, im_ref,
               w1u_ref, w1i_ref, b1_ref, w2_ref, b2_ref, w3_ref, b3_ref,
               wog_ref, wom_ref, bo_ref, out_ref):
    """One batch tile.  Layout: features on sublanes, batch on lanes."""
    f32 = jnp.float32

    # GMF branch: reduce to its logit contribution immediately so the (32, TB)
    # f32 product never stays live across the matmuls.  f32 VPU path (v5e-safe).
    gmf_logit = jnp.sum(ug_ref[...] * ig_ref[...] * wog_ref[...],
                        axis=0, keepdims=True)                            # (1, TB)

    # MLP layer 1 as a split-K (K=32+32) bf16 matmul: avoids the wrapper-side
    # concat of [um, im].  Batch is the MXU column dimension (N = TB), f32 acc.
    h = (jnp.dot(w1u_ref[...], um_ref[...], preferred_element_type=f32)
         + jnp.dot(w1i_ref[...], im_ref[...], preferred_element_type=f32))
    h = jnp.maximum(h + b1_ref[...], 0.0)                                 # (64, TB)

    h = jnp.dot(w2_ref[...], h.astype(w2_ref.dtype), preferred_element_type=f32)
    h = jnp.maximum(h + b2_ref[...], 0.0)                                 # (32, TB)

    h = jnp.dot(w3_ref[...], h.astype(w3_ref.dtype), preferred_element_type=f32)
    h = jnp.maximum(h + b3_ref[...], 0.0)                                 # (16, TB)

    # Output layer (out_features = 1): VPU multiply + sublane reduction instead
    # of near-empty N=1 MXU passes.
    logit = (gmf_logit
             + jnp.sum(h * wom_ref[...], axis=0, keepdims=True)
             + bo_ref[...])                                               # (1, TB)

    out_ref[...] = jax.nn.sigmoid(logit)


def prepare_params(params, embedding_dim=EMBEDDING_DIM):
    """One-time kernel-ready param prep (casts, splits, column-vector biases)."""
    bf16 = jnp.bfloat16
    w1 = params["w1"].astype(bf16)                       # (64, 64)  [out, in]
    wo_col = params["wo"].T                              # (48, 1)
    return {
        # GMF tables stay f32 (VPU path straight into the logit).
        "user_emb_gmf": params["user_emb_gmf"],
        "item_emb_gmf": params["item_emb_gmf"],
        # MLP tables in bf16: halves the gather's HBM read/write traffic.
        "user_emb_mlp": params["user_emb_mlp"].astype(bf16),
        "item_emb_mlp": params["item_emb_mlp"].astype(bf16),
        # Layer-1 split along K so the kernel never needs concat(um, im).
        "w1u": w1[:, :embedding_dim], "w1i": w1[:, embedding_dim:],
        "b1": params["b1"].reshape(-1, 1),
        "w2": params["w2"].astype(bf16), "b2": params["b2"].reshape(-1, 1),
        "w3": params["w3"].astype(bf16), "b3": params["b3"].reshape(-1, 1),
        # Output Linear(48, 1) split along its input axis: rows [:32] hit GMF,
        # rows [32:] hit the MLP -> no [gmf, mlp] concat in the kernel.
        "wo_gmf": wo_col[:embedding_dim, :],             # (32, 1)
        "wo_mlp": wo_col[embedding_dim:, :],             # (16, 1)
        "bo": params["bo"].reshape(1, 1),                # (1, 1)
    }


def ncf_forward(kparams, user, item, *, batch_tile=8192):
    """Full NCF forward.  Gathers in plain JAX, everything dense in the kernel."""
    f32 = jnp.float32

    # Embedding lookups stay in XLA (data-dependent rows).  Transposed layout:
    # batch on lanes, features on sublanes.
    ug = jnp.take(kparams["user_emb_gmf"], user, axis=0).T    # (32, B) f32
    ig = jnp.take(kparams["item_emb_gmf"], item, axis=0).T    # (32, B) f32
    um = jnp.take(kparams["user_emb_mlp"], user, axis=0).T    # (32, B) bf16
    im = jnp.take(kparams["item_emb_mlp"], item, axis=0).T    # (32, B) bf16

    B = user.shape[0]

    # Tile selection: pad the batch only to a multiple of 128, then split into
    # the fewest tiles of <= batch_tile lanes -- but force >= 2 grid steps when
    # there is enough work, so v7x's 2 TensorCores both get a share.
    pb = _round_up(B, 128)
    n_steps = pl.cdiv(pb, batch_tile)
    if pb > 256 and n_steps < 2:
        n_steps = 2
    tile = _round_up(pl.cdiv(pb, n_steps), 128)
    pb = n_steps * tile

    if pb != B:
        pad = ((0, 0), (0, pb - B))
        ug = jnp.pad(ug, pad)
        ig = jnp.pad(ig, pad)
        um = jnp.pad(um, pad)
        im = jnp.pad(im, pad)

    kernel_inputs = (
        ug, ig, um, im,
        kparams["w1u"], kparams["w1i"], kparams["b1"],
        kparams["w2"], kparams["b2"],
        kparams["w3"], kparams["b3"],
        kparams["wo_gmf"], kparams["wo_mlp"], kparams["bo"],
    )

    def tiled(rows):
        # Per-batch-tile inputs: grid step i covers lanes [i*tile, (i+1)*tile).
        return pl.BlockSpec((rows, tile), lambda i: (0, i))

    def resident(x):
        # Weights / biases: constant block index -> stays VMEM-resident.
        return pl.BlockSpec(x.shape, lambda i: (0, 0))

    in_specs = [
        tiled(32), tiled(32), tiled(32), tiled(32),
        resident(kparams["w1u"]), resident(kparams["w1i"]), resident(kparams["b1"]),
        resident(kparams["w2"]), resident(kparams["b2"]),
        resident(kparams["w3"]), resident(kparams["b3"]),
        resident(kparams["wo_gmf"]), resident(kparams["wo_mlp"]),
        resident(kparams["bo"]),
    ]

    out = pl.pallas_call(
        ncf_kernel,
        out_shape=jax.ShapeDtypeStruct((1, pb), f32),
        grid=(pb // tile,),
        in_specs=in_specs,
        out_specs=pl.BlockSpec((1, tile), lambda i: (0, i)),
        compiler_params=pltpu.CompilerParams(
            # Batch tiles shard across v7x's 2 TensorCores.
            dimension_semantics=("parallel",),
            # Explicit headroom for large tiles on v5e's 16 MiB default scope;
            # well under v7x's 64 MiB physical VMEM.
            vmem_limit_bytes=32 * 1024 * 1024,
        ),
    )(*kernel_inputs)

    # prediction.squeeze() in the reference.
    return out[0, :B]


def init_params(key, users, items, embedding_dim=EMBEDDING_DIM, layers=LAYERS):
    """Deterministic synthetic init (shapes match the PyTorch module __init__)."""
    ks = jax.random.split(key, 12)
    f32 = jnp.float32

    def linear(kw, kb, fan_in, fan_out):
        # PyTorch Linear default init: U(-1/sqrt(fan_in), 1/sqrt(fan_in)).
        bound = 1.0 / float(fan_in) ** 0.5
        w = jax.random.uniform(kw, (fan_out, fan_in), f32, -bound, bound)  # [out, in]
        b = jax.random.uniform(kb, (fan_out,), f32, -bound, bound)
        return w, b

    # fc layers: Linear(64, 64), Linear(64, 32), Linear(32, 16)
    w1, b1 = linear(ks[4], ks[5], 2 * embedding_dim, layers[0])
    w2, b2 = linear(ks[6], ks[7], layers[0], layers[1])
    w3, b3 = linear(ks[8], ks[9], layers[1], layers[2])
    # output: Linear(48, 1)
    wo, bo = linear(ks[10], ks[11], embedding_dim + layers[2], 1)

    return {
        # nn.Embedding default init: N(0, 1).
        "user_emb_gmf": jax.random.normal(ks[0], (users, embedding_dim), f32),
        "item_emb_gmf": jax.random.normal(ks[1], (items, embedding_dim), f32),
        "user_emb_mlp": jax.random.normal(ks[2], (users, embedding_dim), f32),
        "item_emb_mlp": jax.random.normal(ks[3], (items, embedding_dim), f32),
        "w1": w1, "b1": b1,
        "w2": w2, "b2": b2,
        "w3": w3, "b3": b3,
        "wo": wo, "bo": bo,
    }


def ncf_reference(params, user, item):
    """Pure-JAX f32 reference mirroring the PyTorch forward."""
    ug = jnp.take(params["user_emb_gmf"], user, axis=0)
    ig = jnp.take(params["item_emb_gmf"], item, axis=0)
    um = jnp.take(params["user_emb_mlp"], user, axis=0)
    im = jnp.take(params["item_emb_mlp"], item, axis=0)
    gmf = ug * ig
    x = jnp.concatenate([um, im], axis=1)
    x = jnp.maximum(x @ params["w1"].T + params["b1"], 0.0)
    x = jnp.maximum(x @ params["w2"].T + params["b2"], 0.0)
    x = jnp.maximum(x @ params["w3"].T + params["b3"], 0.0)
    cat = jnp.concatenate([gmf, x], axis=-1)                        # (B, 48)
    return jnp.squeeze(jax.nn.sigmoid(cat @ params["wo"].T + params["bo"]))


if __name__ == "__main__":
    key = jax.random.PRNGKey(0)
    n_users, n_items, batch = 50, 40, 8

    params = init_params(key, n_users, n_items)
    kparams = prepare_params(params)

    k_u, k_i = jax.random.split(jax.random.PRNGKey(1))
    user = jax.random.randint(k_u, (batch,), 0, n_users, dtype=jnp.int32)
    item = jax.random.randint(k_i, (batch,), 0, n_items, dtype=jnp.int32)

    pred = jax.jit(ncf_forward)(kparams, user, item)
    pred = jax.block_until_ready(pred)

    ref = ncf_reference(params, user, item)
    assert pred.shape == (batch,), pred.shape
    # bf16 MLP weights/embeddings inside the kernel vs. an all-f32 reference.
    assert jnp.allclose(pred, ref, atol=2e-2, rtol=2e-2), (pred, ref)

    print("KERNEL_OK")
</pallas_src>

<mosaic_0001>
module attributes {stable_mosaic.version = 11 : i64} {
  func.func @ncf_kernel(%arg0: i32, %arg1: memref<32x128xf32, #tpu.memory_space<vmem>>, %arg2: memref<32x128xf32, #tpu.memory_space<vmem>>, %arg3: memref<32x128xbf16, #tpu.memory_space<vmem>>, %arg4: memref<32x128xbf16, #tpu.memory_space<vmem>>, %arg5: memref<64x32xbf16, #tpu.memory_space<vmem>>, %arg6: memref<64x32xbf16, #tpu.memory_space<vmem>>, %arg7: memref<64x1xf32, #tpu.memory_space<vmem>>, %arg8: memref<32x64xbf16, #tpu.memory_space<vmem>>, %arg9: memref<32x1xf32, #tpu.memory_space<vmem>>, %arg10: memref<16x32xbf16, #tpu.memory_space<vmem>>, %arg11: memref<16x1xf32, #tpu.memory_space<vmem>>, %arg12: memref<32x1xf32, #tpu.memory_space<vmem>>, %arg13: memref<16x1xf32, #tpu.memory_space<vmem>>, %arg14: memref<1x1xf32, #tpu.memory_space<vmem>>, %arg15: memref<1x128xf32, #tpu.memory_space<vmem>>) attributes {dimension_semantics = [#tpu.dimension_semantics<parallel>], iteration_bounds = array<i64: 1>, scalar_prefetch = 0 : i64, scratch_operands = 0 : i64, tpu.core_type = #tpu.core_type<tc>, window_params = [{transform_indices = @transform_0, window_bounds = array<i64: 32, 128>}, {transform_indices = @transform_1, window_bounds = array<i64: 32, 128>}, {transform_indices = @transform_2, window_bounds = array<i64: 32, 128>}, {transform_indices = @transform_3, window_bounds = array<i64: 32, 128>}, {pipeline_mode = #tpu.pipeline_mode<synchronous>, transform_indices = @transform_4, window_bounds = array<i64: 64, 32>}, {pipeline_mode = #tpu.pipeline_mode<synchronous>, transform_indices = @transform_5, window_bounds = array<i64: 64, 32>}, {pipeline_mode = #tpu.pipeline_mode<synchronous>, transform_indices = @transform_6, window_bounds = array<i64: 64, 1>}, {pipeline_mode = #tpu.pipeline_mode<synchronous>, transform_indices = @transform_7, window_bounds = array<i64: 32, 64>}, {pipeline_mode = #tpu.pipeline_mode<synchronous>, transform_indices = @transform_8, window_bounds = array<i64: 32, 1>}, {pipeline_mode = #tpu.pipeline_mode<synchronous>, transform_indices = @transform_9, window_bounds = array<i64: 16, 32>}, {pipeline_mode = #tpu.pipeline_mode<synchronous>, transform_indices = @transform_10, window_bounds = array<i64: 16, 1>}, {pipeline_mode = #tpu.pipeline_mode<synchronous>, transform_indices = @transform_11, window_bounds = array<i64: 32, 1>}, {pipeline_mode = #tpu.pipeline_mode<synchronous>, transform_indices = @transform_12, window_bounds = array<i64: 16, 1>}, {pipeline_mode = #tpu.pipeline_mode<synchronous>, transform_indices = @transform_13, window_bounds = array<i64: 1, 1>}, {transform_indices = @transform_14, window_bounds = array<i64: 1, 128>}]} {
    %c0 = arith.constant 0 : index
    %c0_0 = arith.constant 0 : index
    %0 = vector.load %arg1[%c0, %c0_0] : memref<32x128xf32, #tpu.memory_space<vmem>>, vector<32x128xf32>
    %c0_1 = arith.constant 0 : index
    %c0_2 = arith.constant 0 : index
    %1 = vector.load %arg2[%c0_1, %c0_2] : memref<32x128xf32, #tpu.memory_space<vmem>>, vector<32x128xf32>
    %2 = arith.mulf %0, %1 : vector<32x128xf32>
    %c0_3 = arith.constant 0 : index
    %c0_4 = arith.constant 0 : index
    %3 = vector.load %arg12[%c0_3, %c0_4] : memref<32x1xf32, #tpu.memory_space<vmem>>, vector<32x1xf32>
    %4 = vector.broadcast %3 : vector<32x1xf32> to vector<32x128xf32>
    %5 = arith.mulf %2, %4 : vector<32x128xf32>
    %cst = arith.constant dense<0.000000e+00> : vector<128xf32>
    %6 = vector.multi_reduction <add>, %5, %cst [0] : vector<32x128xf32> to vector<128xf32>
    %7 = vector.shape_cast %6 : vector<128xf32> to vector<1x128xf32>
    %c0_5 = arith.constant 0 : index
    %c0_6 = arith.constant 0 : index
    %8 = vector.load %arg5[%c0_5, %c0_6] : memref<64x32xbf16, #tpu.memory_space<vmem>>, vector<64x32xbf16>
    %c0_7 = arith.constant 0 : index
    %c0_8 = arith.constant 0 : index
    %9 = vector.load %arg3[%c0_7, %c0_8] : memref<32x128xbf16, #tpu.memory_space<vmem>>, vector<32x128xbf16>
    %cst_9 = arith.constant dense<0.000000e+00> : vector<64x128xf32>
    %10 = tpu.matmul %8, %9, %cst_9 {dimension_numbers = #tpu.dot_dimension_numbers<[1], [0], [0], [1], [0, 0, 1, 1], [], []>} : vector<64x32xbf16>, vector<32x128xbf16>, vector<64x128xf32> -> vector<64x128xf32>
    %c0_10 = arith.constant 0 : index
    %c0_11 = arith.constant 0 : index
    %11 = vector.load %arg6[%c0_10, %c0_11] : memref<64x32xbf16, #tpu.memory_space<vmem>>, vector<64x32xbf16>
    %c0_12 = arith.constant 0 : index
    %c0_13 = arith.constant 0 : index
    %12 = vector.load %arg4[%c0_12, %c0_13] : memref<32x128xbf16, #tpu.memory_space<vmem>>, vector<32x128xbf16>
    %cst_14 = arith.constant dense<0.000000e+00> : vector<64x128xf32>
    %13 = tpu.matmul %11, %12, %cst_14 {dimension_numbers = #tpu.dot_dimension_numbers<[1], [0], [0], [1], [0, 0, 1, 1], [], []>} : vector<64x32xbf16>, vector<32x128xbf16>, vector<64x128xf32> -> vector<64x128xf32>
    %14 = arith.addf %10, %13 : vector<64x128xf32>
    %c0_15 = arith.constant 0 : index
    %c0_16 = arith.constant 0 : index
    %15 = vector.load %arg7[%c0_15, %c0_16] : memref<64x1xf32, #tpu.memory_space<vmem>>, vector<64x1xf32>
    %16 = vector.broadcast %15 : vector<64x1xf32> to vector<64x128xf32>
    %17 = arith.addf %14, %16 : vector<64x128xf32>
    %cst_17 = arith.constant 0.000000e+00 : f32
    %18 = vector.broadcast %cst_17 : f32 to vector<64x128xf32>
    %19 = arith.maximumf %17, %18 : vector<64x128xf32>
    %c0_18 = arith.constant 0 : index
    %c0_19 = arith.constant 0 : index
    %20 = vector.load %arg8[%c0_18, %c0_19] : memref<32x64xbf16, #tpu.memory_space<vmem>>, vector<32x64xbf16>
    %21 = arith.truncf %19 : vector<64x128xf32> to vector<64x128xbf16>
    %cst_20 = arith.constant dense<0.000000e+00> : vector<32x128xf32>
    %22 = tpu.matmul %20, %21, %cst_20 {dimension_numbers = #tpu.dot_dimension_numbers<[1], [0], [0], [1], [0, 0, 1, 1], [], []>} : vector<32x64xbf16>, vector<64x128xbf16>, vector<32x128xf32> -> vector<32x128xf32>
    %c0_21 = arith.constant 0 : index
    %c0_22 = arith.constant 0 : index
    %23 = vector.load %arg9[%c0_21, %c0_22] : memref<32x1xf32, #tpu.memory_space<vmem>>, vector<32x1xf32>
    %24 = vector.broadcast %23 : vector<32x1xf32> to vector<32x128xf32>
    %25 = arith.addf %22, %24 : vector<32x128xf32>
    %cst_23 = arith.constant 0.000000e+00 : f32
    %26 = vector.broadcast %cst_23 : f32 to vector<32x128xf32>
    %27 = arith.maximumf %25, %26 : vector<32x128xf32>
    %c0_24 = arith.constant 0 : index
    %c0_25 = arith.constant 0 : index
    %28 = vector.load %arg10[%c0_24, %c0_25] : memref<16x32xbf16, #tpu.memory_space<vmem>>, vector<16x32xbf16>
    %29 = arith.truncf %27 : vector<32x128xf32> to vector<32x128xbf16>
    %cst_26 = arith.constant dense<0.000000e+00> : vector<16x128xf32>
    %30 = tpu.matmul %28, %29, %cst_26 {dimension_numbers = #tpu.dot_dimension_numbers<[1], [0], [0], [1], [0, 0, 1, 1], [], []>} : vector<16x32xbf16>, vector<32x128xbf16>, vector<16x128xf32> -> vector<16x128xf32>
    %c0_27 = arith.constant 0 : index
    %c0_28 = arith.constant 0 : index
    %31 = vector.load %arg11[%c0_27, %c0_28] : memref<16x1xf32, #tpu.memory_space<vmem>>, vector<16x1xf32>
    %32 = vector.broadcast %31 : vector<16x1xf32> to vector<16x128xf32>
    %33 = arith.addf %30, %32 : vector<16x128xf32>
    %cst_29 = arith.constant 0.000000e+00 : f32
    %34 = vector.broadcast %cst_29 : f32 to vector<16x128xf32>
    %35 = arith.maximumf %33, %34 : vector<16x128xf32>
    %c0_30 = arith.constant 0 : index
    %c0_31 = arith.constant 0 : index
    %36 = vector.load %arg13[%c0_30, %c0_31] : memref<16x1xf32, #tpu.memory_space<vmem>>, vector<16x1xf32>
    %37 = vector.broadcast %36 : vector<16x1xf32> to vector<16x128xf32>
    %38 = arith.mulf %35, %37 : vector<16x128xf32>
    %cst_32 = arith.constant dense<0.000000e+00> : vector<128xf32>
    %39 = vector.multi_reduction <add>, %38, %cst_32 [0] : vector<16x128xf32> to vector<128xf32>
    %40 = vector.shape_cast %39 : vector<128xf32> to vector<1x128xf32>
    %41 = arith.addf %7, %40 : vector<1x128xf32>
    %c0_33 = arith.constant 0 : index
    %c0_34 = arith.constant 0 : index
    %42 = vector.load %arg14[%c0_33, %c0_34] : memref<1x1xf32, #tpu.memory_space<vmem>>, vector<1x1xf32>
    %43 = vector.broadcast %42 : vector<1x1xf32> to vector<1x128xf32>
    %44 = arith.addf %41, %43 : vector<1x128xf32>
    %45 = arith.negf %44 : vector<1x128xf32>
    %46 = math.exp %45 : vector<1x128xf32>
    %cst_35 = arith.constant 1.000000e+00 : f32
    %47 = vector.broadcast %cst_35 : f32 to vector<1x128xf32>
    %48 = arith.addf %47, %46 : vector<1x128xf32>
    %49 = arith.divf %47, %48 : vector<1x128xf32>
    %c0_36 = arith.constant 0 : index
    %c0_37 = arith.constant 0 : index
    %50 = vector.load %arg15[%c0_36, %c0_37] : memref<1x128xf32, #tpu.memory_space<vmem>>, vector<1x128xf32>
    tpu.vector_store %arg15[%c0_36, %c0_37], %49 {strides = array<i32>} : memref<1x128xf32, #tpu.memory_space<vmem>>, vector<1x128xf32>,
    return
  }
  func.func @transform_0(%arg0: i32) -> (i32, i32) {
    %c0_i32 = arith.constant 0 : i32
    %c0_i32_0 = arith.constant 0 : i32
    return %c0_i32, %arg0 : i32, i32
  }
  func.func @transform_1(%arg0: i32) -> (i32, i32) {
    %c0_i32 = arith.constant 0 : i32
    %c0_i32_0 = arith.constant 0 : i32
    return %c0_i32, %arg0 : i32, i32
  }
  func.func @transform_2(%arg0: i32) -> (i32, i32) {
    %c0_i32 = arith.constant 0 : i32
    %c0_i32_0 = arith.constant 0 : i32
    return %c0_i32, %arg0 : i32, i32
  }
  func.func @transform_3(%arg0: i32) -> (i32, i32) {
    %c0_i32 = arith.constant 0 : i32
    %c0_i32_0 = arith.constant 0 : i32
    return %c0_i32, %arg0 : i32, i32
  }
  func.func @transform_4(%arg0: i32) -> (i32, i32) {
    %c0_i32 = arith.constant 0 : i32
    %c0_i32_0 = arith.constant 0 : i32
    %c0_i32_1 = arith.constant 0 : i32
    return %c0_i32, %c0_i32_0 : i32, i32
  }
  func.func @transform_5(%arg0: i32) -> (i32, i32) {
    %c0_i32 = arith.constant 0 : i32
    %c0_i32_0 = arith.constant 0 : i32
    %c0_i32_1 = arith.constant 0 : i32
    return %c0_i32, %c0_i32_0 : i32, i32
  }
  func.func @transform_6(%arg0: i32) -> (i32, i32) {
    %c0_i32 = arith.constant 0 : i32
    %c0_i32_0 = arith.constant 0 : i32
    %c0_i32_1 = arith.constant 0 : i32
    return %c0_i32, %c0_i32_0 : i32, i32
  }
  func.func @transform_7(%arg0: i32) -> (i32, i32) {
    %c0_i32 = arith.constant 0 : i32
    %c0_i32_0 = arith.constant 0 : i32
    %c0_i32_1 = arith.constant 0 : i32
    return %c0_i32, %c0_i32_0 : i32, i32
  }
  func.func @transform_8(%arg0: i32) -> (i32, i32) {
    %c0_i32 = arith.constant 0 : i32
    %c0_i32_0 = arith.constant 0 : i32
    %c0_i32_1 = arith.constant 0 : i32
    return %c0_i32, %c0_i32_0 : i32, i32
  }
  func.func @transform_9(%arg0: i32) -> (i32, i32) {
    %c0_i32 = arith.constant 0 : i32
    %c0_i32_0 = arith.constant 0 : i32
    %c0_i32_1 = arith.constant 0 : i32
    return %c0_i32, %c0_i32_0 : i32, i32
  }
  func.func @transform_10(%arg0: i32) -> (i32, i32) {
    %c0_i32 = arith.constant 0 : i32
    %c0_i32_0 = arith.constant 0 : i32
    %c0_i32_1 = arith.constant 0 : i32
    return %c0_i32, %c0_i32_0 : i32, i32
  }
  func.func @transform_11(%arg0: i32) -> (i32, i32) {
    %c0_i32 = arith.constant 0 : i32
    %c0_i32_0 = arith.constant 0 : i32
    %c0_i32_1 = arith.constant 0 : i32
    return %c0_i32, %c0_i32_0 : i32, i32
  }
  func.func @transform_12(%arg0: i32) -> (i32, i32) {
    %c0_i32 = arith.constant 0 : i32
    %c0_i32_0 = arith.constant 0 : i32
    %c0_i32_1 = arith.constant 0 : i32
    return %c0_i32, %c0_i32_0 : i32, i32
  }
  func.func @transform_13(%arg0: i32) -> (i32, i32) {
    %c0_i32 = arith.constant 0 : i32
    %c0_i32_0 = arith.constant 0 : i32
    %c0_i32_1 = arith.constant 0 : i32
    return %c0_i32, %c0_i32_0 : i32, i32
  }
  func.func @transform_14(%arg0: i32) -> (i32, i32) {
    %c0_i32 = arith.constant 0 : i32
    %c0_i32_0 = arith.constant 0 : i32
    return %c0_i32, %arg0 : i32, i32
  }
}

</mosaic_0001>

<bundles_post_ra>
// kernel: ncf_forward.1
= control target key start
LH: loop header
LB: loop body
LE: loop exit
PB: predicated region body
PF: predicated region fallthrough
CT: control target
= control target key end

     0   :  { %v743_v1 = vmov 0   ;;  %vm155_vm0 = vcmask 261120   ;;  %vm448_vm1 = vcmask 523264   ;;  %vm745_vm2 = vmmov 0   ;;  %s967_s3 = inlined_call_operand.vmem [shape: bf16[32,128], index: 3, kind: input, shape index: {}]   ;;  %s968_s5 = inlined_call_operand.vmem [shape: bf16[64,32], index: 5, kind: input, shape index: {}]   ;;  %s969_s13 = inlined_call_operand.<no memory space> [shape: f32[1,1], index: 13, kind: input, shape index: {}]   ;;  %s970_s2 = inlined_call_operand.vmem [shape: bf16[32,128], index: 2, kind: input, shape index: {}]   ;;  %s971_s4 = inlined_call_operand.vmem [shape: bf16[64,32], index: 4, kind: input, shape index: {}]   ;;  %s972_s6 = inlined_call_operand.vmem [shape: f32[64,1], index: 6, kind: input, shape index: {}]   ;;  %s973_s8 = inlined_call_operand.vmem [shape: f32[32,1], index: 8, kind: input, shape index: {}]   ;;  %s974_s11 = inlined_call_operand.vmem [shape: f32[32,1], index: 11, kind: input, shape index: {}]   ;;  %s975_s10 = inlined_call_operand.vmem [shape: f32[16,1], index: 10, kind: input, shape index: {}]   ;;  %s976_s12 = inlined_call_operand.vmem [shape: f32[16,1], index: 12, kind: input, shape index: {}]   ;;  %s977_s7 = inlined_call_operand.vmem [shape: bf16[32,64], index: 7, kind: input, shape index: {}]   ;;  %s978_s9 = inlined_call_operand.vmem [shape: bf16[16,32], index: 9, kind: input, shape index: {}]   ;;  %s979_s0 = inlined_call_operand.vmem [shape: f32[32,128], index: 0, kind: input, shape index: {}]   ;;  %s980_s1 = inlined_call_operand.vmem [shape: f32[32,128], index: 1, kind: input, shape index: {}]   ;;  %s981_s14 = inlined_call_operand.vmem [shape: f32[1,128], index: 14, kind: output, shape index: {}]  }
   0x1   :  { %v724_v0 = vld [vmem:[%s967_s3] sm:$0xff]   ;;  %722 = vset.pattern.permute.xlu0 %v743_v1  ;;  %723 = vset.pattern.permute.xlu1 %v743_v1  ;;  %v19_v2 = vstv %s969_s13  ;;  %v725_v3 = vld [vmem:[%s967_s3 + $0x8] sm:$0xff]   ;;  %v729_v7 = vld [vmem:[%s968_s5 + $0x10] sm:$0xff]  }
   0x2   :  { %20 = vst [vmem:[#allocation2] sm:$0x1] %v19_v2  ;;  %667 = vmatprep.subr.bf16.mxu0 %v724_v0  ;;  %v726_v4 = vld [vmem:[%s968_s5] sm:$0xff]   ;;  %v727_v6 = vld [vmem:[%s968_s5 + $0x8] sm:$0xff]   ;;  %v344_v10 = vld [vmem:[%s972_s6 + $0x10] sm:$0xff] }
   0x3   :  { %668 = vmatpush3.bf16.msra.mxu0 %v724_v0  ;;  %671 = vmatprep.mubr.msk.bf16.mxu0 %vm155_vm0, %v726_v4  ;;  %v728_v5 = vld [vmem:[%s970_s2] sm:$0xff]   ;;  %v731_v8 = vld [vmem:[%s970_s2 + $0x8] sm:$0xff]   ;;  %v730_v11 = vld [vmem:[%s968_s5 + $0x18] sm:$0xff]  }
   0x4   :  { %669 = vmatprep.subr.bf16.mxu0 %v725_v3  ;;  %v342_v9 = vld [vmem:[%s972_s6] sm:$0xff]  ;;  %362 = vperm.xlu1 %723, %v344_v10   ;;  %v343_v12 = vld [vmem:[%s972_s6 + $0x8] sm:$0xff]  ;;  %v345_v13 = vld [vmem:[%s972_s6 + $0x18] sm:$0xff] }
   0x5   :  { %352 = vperm.xlu0 %722, %v342_v9   ;;  %v732_v14 = vld [vmem:[%s971_s4] sm:$0xff]   ;;  %v347_v16 = vld [vmem:[%s972_s6 + $0x28] sm:$0xff]  ;;  %v348_v18 = vld [vmem:[%s972_s6 + $0x30] sm:$0xff]  ;;  %v744_v9 = vmov 0.0  }
   0x6   :  { %v346_v15 = vld [vmem:[%s972_s6 + $0x20] sm:$0xff]  ;;  %v733_v17 = vld [vmem:[%s971_s4 + $0x8] sm:$0xff]   ;;  %v349_v19 = vld [vmem:[%s972_s6 + $0x38] sm:$0xff] }
   0x7   :  { %670 = vmatpush3.bf16.msra.mxu0 %v725_v3  ;;  %v734_v20 = vld [vmem:[%s971_s4 + $0x10] sm:$0xff]   ;;  %v414_v21 = vld [vmem:[%s973_s8] sm:$0xff]  ;;  %v415_v22 = vld [vmem:[%s973_s8 + $0x8] sm:$0xff] }
   0x8   :  { %679 = vmatprep.subr.bf16.mxu0 %v728_v5  ;;  %367 = vperm.xlu1 %723, %v345_v13   ;;  %v735_v23 = vld [vmem:[%s971_s4 + $0x18] sm:$0xff]   ;;  %v416_v24 = vld [vmem:[%s973_s8 + $0x10] sm:$0xff]  ;;  %v62_v26 = vld [vmem:[%s974_s11] sm:$0xff] }
   0x9   :  { %357 = vperm.xlu0 %722, %v343_v12   ;;  %v417_v25 = vld [vmem:[%s973_s8 + $0x18] sm:$0xff]  ;;  %v63_v27 = vld [vmem:[%s974_s11 + $0x8] sm:$0xff]  ;;  %v512_v28 = vld [vmem:[%s975_s10] sm:$0xff] }
   0xa   :  { %672 = vmatmul.mubr.msk.bf16.vlgmr.msra.gmra.mrb[0].mxu0 %vm155_vm0, %v727_v6  ;;  %v513_v29 = vld [vmem:[%s975_s10 + $0x8] sm:$0xff]  ;;  %v64_v30 = vld [vmem:[%s974_s11 + $0x10] sm:$0xff]  ;;  %v65_v31 = vld [vmem:[%s974_s11 + $0x18] sm:$0xff] }
   0xb   :  { %680 = vmatpush3.bf16.msra.mxu0 %v728_v5  ;;  %675 = vmatprep.mubr.msk.bf16.mxu0 %vm155_vm0, %v729_v7  ;;  %v575_v32 = vld [vmem:[%s976_s12] sm:$0xff]  ;;  %v576_v33 = vld [vmem:[%s976_s12 + $0x8] sm:$0xff] }
   0xc   :  { %681 = vmatprep.subr.bf16.mxu0 %v731_v8  ;;  %377 = vperm.xlu1 %723, %v347_v16   ;;  %v597_v34 = vld [vmem:[#allocation2] sm:$0x1] }
   0xd   :  { %372 = vperm.xlu0 %722, %v346_v15   ;;  %v736_v35 = vld [vmem:[%s977_s7] sm:$0xff]  }
   0xe   :  { %699 = vmatprep.mubr.msk.bf16.mxu1 %vm448_vm1, %v736_v35 }
   0xf   :  { %682 = vmatpush3.bf16.msra.mxu0 %v731_v8  ;;  %v737_v8 = vld [vmem:[%s977_s7 + $0x8] sm:$0xff]  }
  0x10   :  { %387 = vperm.xlu1 %723, %v349_v19  }
  0x11   :  { %382 = vperm.xlu0 %722, %v348_v18  }
  0x12   :  { %676 = vmatmul.mubr.msk.bf16.gmra.mrb[4].mxu0 %vm155_vm0, %v730_v11 }
  0x13   :  { %683 = vmatprep.mubr.msk.bf16.mxu0 %vm155_vm0, %v732_v14 }
  0x14   :  { %425 = vperm.xlu1 %723, %v415_v22  }
  0x15   :  { %420 = vperm.xlu0 %722, %v414_v21  }
  0x18   :  { %435 = vperm.xlu1 %723, %v417_v25  }
  0x19   :  { %430 = vperm.xlu0 %722, %v416_v24  }
  0x1a   :  { %684 = vmatmul.mubr.msk.bf16.vlgmr.msra.gmra.mrb[0].mxu0 %vm155_vm0, %v733_v17 }
  0x1b   :  { %687 = vmatprep.mubr.msk.bf16.mxu0 %vm155_vm0, %v734_v20 }
  0x1c   :  { %73 = vperm.xlu1 %723, %v63_v27  }
  0x1d   :  { %68 = vperm.xlu0 %722, %v62_v26  }
  0x20   :  { %521 = vperm.xlu1 %723, %v513_v29  }
  0x21   :  { %516 = vperm.xlu0 %722, %v512_v28   ;;  %v738_v28 = vld [vmem:[%s978_s9] sm:$0xff]  }
  0x22   :  { %688 = vmatmul.mubr.msk.bf16.gmra.mrb[4].mxu0 %vm155_vm0, %v735_v23 }
  0x24   :  { %83 = vperm.xlu1 %723, %v65_v31   ;;  %v54_v31 = vld [vmem:[%s980_s1] sm:$0xff] }
  0x25   :  { %78 = vperm.xlu0 %722, %v64_v30   ;;  %v50_v30 = vld [vmem:[%s979_s0] sm:$0xff] }
  0x26   :  { %v58_v35 = vmul.f32 %v54_v31, %v50_v30 }
  0x28   :  { %584 = vperm.xlu1 %723, %v576_v33   ;;  %v51_v33 = vld [vmem:[%s979_s0 + $0x8] sm:$0xff] }
  0x29   :  { %579 = vperm.xlu0 %722, %v575_v32  }
  0x2d   :  { %600 = vperm.xlu0 %722, %v597_v34   ;;  %v55_v34 = vld [vmem:[%s980_s1 + $0x8] sm:$0xff] }
  0x83   :  { %v363_v37 = vpop.permute.xlu1 %362 }
  0x84   :  { %v353_v36 = vpop.permute.xlu0 %352 }
  0x87   :  { %v368_v39 = vpop.permute.xlu1 %367 }
  0x88   :  { %v358_v38 = vpop.permute.xlu0 %357 }
  0x8b   :  { %v378_v48 = vpop.permute.xlu1 %377 }
  0x8c   :  { %v373_v43 = vpop.permute.xlu0 %372 }
  0x8f   :  { %v388_v60 = vpop.permute.xlu1 %387 }
  0x90   :  { %v383_v55 = vpop.permute.xlu0 %382 }
  0x93   :  { %v426_v11 = vpop.permute.xlu1 %425 }
  0x94   :  { %v421_v10 = vpop.permute.xlu0 %420 }
  0x97   :  { %v436_v16 = vpop.permute.xlu1 %435 }
  0x98   :  { %v431_v12 = vpop.permute.xlu0 %430 }
  0x9b   :  { %v74_v32 = vpop.permute.xlu1 %73 }
  0x9c   :  { %v69_v29 = vpop.permute.xlu0 %68 }
  0xed   :  { %v685_v40 = vpop.f32.mrb[0].mxu0 }
  0xee   :  { %v392_v41 = vadd.f32 %v685_v40, %v363_v37  ;;  %v311_v42 = vpop.f32.mrb[1].mxu0  ;;  %v517_v37 = vpop.permute.xlu0 %516 }
  0xef   :  { %v390_v44 = vadd.f32 %v353_v36, %v311_v42  ;;  %v686_v45 = vpop.f32.mrb[2].mxu0  ;;  %v59_v36 = vmul.f32 %v55_v34, %v51_v33  ;;  %v522_v40 = vpop.permute.xlu1 %521 }
  0xf0   :  { %v393_v46 = vadd.f32 %v686_v45, %v368_v39  ;;  %v314_v47 = vpop.f32.mrb[3].mxu0  ;;  %v400_v50 = vmax.f32 %v392_v41, 0.0  ;;  %v56_v39 = vld [vmem:[%s980_s1 + $0x10] sm:$0xff]  ;;  %v86_v41 = vmul.f32 %v69_v29, %v58_v35  ;;  %v57_v45 = vld [vmem:[%s980_s1 + $0x18] sm:$0xff] }
  0xf1   :  { %v391_v49 = vadd.f32 %v358_v38, %v314_v47  ;;  %v398_v52 = vmax.f32 %v390_v44, 0.0  ;;  %v52_v38 = vld [vmem:[%s979_s0 + $0x10] sm:$0xff]  ;;  %v87_v42 = vmul.f32 %v74_v32, %v59_v36  ;;  %v53_v44 = vld [vmem:[%s979_s0 + $0x18] sm:$0xff] }
  0xf2   :  { %v401_v51 = vmax.f32 %v393_v46, 0.0  ;;  %v79_v46 = vpop.permute.xlu0 %78 }
  0xf3   :  { %v399_v53 = vmax.f32 %v391_v49, 0.0  ;;  %v90_v47 = vadd.f32 %v87_v42, %v86_v41  ;;  %v61_v49 = vmul.f32 %v57_v45, %v53_v44 }
  0xf4   :  { %v411_v54 = vpack.c.bf16 %v401_v51, %v400_v50  ;;  %v84_v50 = vpop.permute.xlu1 %83 }
  0xf5   :  { %v689_v56 = vpop.f32.mrb[4].mxu0  ;;  %v410_v57 = vpack.c.bf16 %v399_v53, %v398_v52  ;;  %v89_v52 = vmul.f32 %v84_v50, %v61_v49 }
  0xf6   :  { %v396_v58 = vadd.f32 %v689_v56, %v383_v55  ;;  %v327_v59 = vpop.f32.mrb[5].mxu0 }
  0xf7   :  { %v394_v61 = vadd.f32 %v373_v43, %v327_v59  ;;  %v690_v62 = vpop.f32.mrb[6].mxu0  ;;  %691 = vmatprep.subr.bf16.mxu1 %v410_v57  ;;  %v60_v43 = vmul.f32 %v56_v39, %v52_v38 }
  0xf8   :  { %v397_v63 = vadd.f32 %v690_v62, %v388_v60  ;;  %v330_v0 = vpop.f32.mrb[7].mxu0  ;;  %692 = vmatpush3.bf16.msra.mxu1 %v410_v57  ;;  %v404_v2 = vmax.f32 %v396_v58, 0.0 }
  0xf9   :  { %v395_v1 = vadd.f32 %v378_v48, %v330_v0  ;;  %693 = vmatprep.subr.bf16.mxu1 %v411_v54  ;;  %v402_v4 = vmax.f32 %v394_v61, 0.0  ;;  %v88_v48 = vmul.f32 %v79_v46, %v60_v43  ;;  %v580_v0 = vpop.permute.xlu0 %579 }
  0xfa   :  { %v405_v3 = vmax.f32 %v397_v63, 0.0 }
  0xfb   :  { %v403_v5 = vmax.f32 %v395_v1, 0.0  ;;  %v91_v51 = vadd.f32 %v90_v47, %v88_v48  ;;  %v585_v1 = vpop.permute.xlu1 %584 }
  0xfc   :  { %v413_v6 = vpack.c.bf16 %v405_v3, %v404_v2  ;;  %694 = vmatpush3.bf16.msra.mxu1 %v411_v54 }
  0xfd   :  { %v412_v7 = vpack.c.bf16 %v403_v5, %v402_v4  ;;  %v92_v53 = vadd.f32 %v91_v51, %v89_v52 }
  0xff   :  { %695 = vmatprep.subr.bf16.mxu1 %v412_v7  ;;  %v93_v55 = vrot.slane %v92_v53, 4 }
 0x100   :  { %696 = vmatpush3.bf16.msra.mxu1 %v412_v7 }
 0x101   :  { %697 = vmatprep.subr.bf16.mxu1 %v413_v6  ;;  %v94_v62 = vadd.f32 %v93_v55, %v92_v53 }
 0x103   :  { %v95_v4 = vrot.slane %v94_v62, 2 }
 0x104   :  { %698 = vmatpush3.bf16.msra.mxu1 %v413_v6  ;;  %v603_v6 = vlaneseq }
 0x105   :  { %703 = vmatprep.subr.bf16.mxu1 %v744_v9 }
 0x107   :  { %700 = vmatmul.mubr.msk.bf16.vlgmr.msra.gmra.mrb[0].mxu1 %vm448_vm1, %v737_v8  ;;  %v96_v8 = vadd.f32 %v95_v4, %v94_v62 }
 0x108   :  { %707 = vmatprep.mubr.msk.bf16.mxu1 %vm745_vm2, %v744_v9 }
 0x1da   :  { %v701_v13 = vpop.f32.mrb[0].mxu1 }
 0x1db   :  { %v498_v14 = vadd.f32 %v701_v13, %v431_v12  ;;  %v489_v15 = vpop.f32.mrb[1].mxu1  ;;  %v97_v12 = vrot.slane %v96_v8, 1 }
 0x1dc   :  { %v490_v17 = vadd.f32 %v489_v15, %v421_v10  ;;  %v702_v18 = vpop.f32.mrb[2].mxu1  ;;  %v604_v10 = vshrl.u32 %v603_v6, 7 }
 0x1dd   :  { %v501_v19 = vadd.f32 %v702_v18, %v436_v16  ;;  %v492_v20 = vpop.f32.mrb[3].mxu1  ;;  %v506_v22 = vmax.f32 %v498_v14, 0.0  ;;  %v601_v16 = vpop.permute.xlu0 %600 }
 0x1de   :  { %v493_v21 = vadd.f32 %v492_v20, %v426_v11  ;;  %v504_v24 = vmax.f32 %v490_v17, 0.0  ;;  %v605_v14 = vsub.s32 0, %v604_v10  ;;  %v98_v17 = vadd.f32 %v97_v12, %v96_v8 }
 0x1df   :  { %v507_v23 = vmax.f32 %v501_v19, 0.0 }
 0x1e0   :  { %v505_v25 = vmax.f32 %v493_v21, 0.0  ;;  %v606_v19 = vrot.slane %v601_v16, %v605_v14 }
 0x1e1   :  { %v511_v26 = vpack.c.bf16 %v507_v23, %v506_v22 }
 0x1e2   :  { %v510_v27 = vpack.c.bf16 %v505_v25, %v504_v24 }
 0x1e4   :  { %704 = vmatpush3.bf16.msra.mxu1 %v510_v27 }
 0x1e5   :  { %705 = vmatprep.subr.bf16.mxu1 %v744_v9 }
 0x1e8   :  { %706 = vmatpush3.bf16.msra.mxu1 %v511_v26 }
 0x1eb   :  { %708 = vmatmul.mubr.msk.bf16.vlgmr.msra.gmra.mrb[4].mxu1 %vm155_vm0, %v738_v28 }
 0x2be   :  { %v566_v54 = vpop.f32.mrb[4].mxu1 }
 0x2bf   :  { %v567_v56 = vadd.f32 %v566_v54, %v517_v37  ;;  %v709_v57 = vpop.f32.mrb[5].mxu1 }
 0x2c0   :  { %v569_v58 = vpop.f32.mrb[6].mxu1 }
 0x2c1   :  { %v573_v59 = vmax.f32 %v567_v56, 0.0  ;;  %v570_v60 = vadd.f32 %v569_v58, %v522_v40  ;;  %v710_v61 = vpop.f32.mrb[7].mxu1 }
 0x2c3   :  { %v574_v63 = vmax.f32 %v570_v60, 0.0  ;;  %v587_v2 = vmul.f32 %v580_v0, %v573_v59 }
 0x2c5   :  { %v588_v3 = vmul.f32 %v585_v1, %v574_v63 }
 0x2c7   :  { %v589_v5 = vadd.f32 %v588_v3, %v587_v2 }
 0x2c9   :  { %v590_v7 = vrot.slane %v589_v5, 4 }
 0x2cb   :  { %v591_v9 = vadd.f32 %v590_v7, %v589_v5 }
 0x2cd   :  { %v592_v11 = vrot.slane %v591_v9, 2 }
 0x2cf   :  { %v593_v13 = vadd.f32 %v592_v11, %v591_v9 }
 0x2d1   :  { %v594_v15 = vrot.slane %v593_v13, 1 }
 0x2d3   :  { %v595_v18 = vadd.f32 %v594_v15, %v593_v13 }
 0x2d5   :  { %v596_v20 = vadd.f32 %v595_v18, %v98_v17 }
 0x2d7   :  { %v607_v21 = vadd.f32 %v606_v19, %v596_v20 }
 0x2d9   :  { %v645_v22 = vmul.f32 -1.442695, %v607_v21 }
 0x2db   :  { %739 = vpow2.f32 %v645_v22 }
 0x2e5   :  { %v740_v23 = vpop.eup %739 }
 0x2e6   :  { %v611_v24 = vadd.f32 1.0, %v740_v23 }
 0x2e8   :  { %741 = vrcp.f32 %v611_v24 }
 0x2f2   :  { %v742_v25 = vpop.eup %741 }
 0x2f3   :  { %614 = vst [vmem:[%s981_s14] sm:$0x1] %v742_v25 }

</bundles_post_ra>
